<compile_context>
chip_gen: v7x
topology: tpu7x:2x2x1
jax: 0.10.0
libtpu: 0.0.40
codegen_flags: <defaults>
</compile_context>

<pallas_src>
import functools

import numpy as np
import jax
import jax.numpy as jnp
from jax import lax
from jax.experimental import pallas as pl
from jax.experimental.pallas import tpu as pltpu


_MAX_STRIP_ROWS = 64                 # output rows per conv grid step (bounds VMEM)
_VMEM_LIMIT = 48 * 1024 * 1024       # leave headroom below v7x's 64 MiB per-TC VMEM


def _round_up(x, m):
    return (x + m - 1) // m * m


def _largest_divisor(n, cap, multiple_of=1):
    """Largest divisor of n that is <= cap and a multiple of `multiple_of`."""
    for d in range(min(n, cap), 0, -1):
        if n % d == 0 and d % multiple_of == 0:
            return d
    return n


# ---------------------------------------------------------------------------
# 3x3 'same' conv kernel (general path, Cin >= 64)
# ---------------------------------------------------------------------------

def _conv3x3_kernel(x_hbm, w_ref, b_ref, *refs, th, wd, wp_pad, apply_relu, want_pre):
    """One (image, row-strip) step of a 3x3 stride-1 'same' conv.

    x_hbm : (N, H, W, Cin) bf16, left in HBM; halo window DMA'd manually below.
    w_ref : (3, 3*Cin, Cout) bf16  -- per-dy weights, dx folded into K.
    b_ref : (1, Cout) f32.
    out   : (1, th, W, Cout) bf16 block(s); two of them when want_pre.
    scratch: xbuf (th+4, wp_pad, Cin) bf16, sem = DMA((3,)).

    Scratch rows: 0 -> zero (wrap pad), 1 -> top halo, 2..th+1 -> strip rows,
                  th+2 -> bottom halo, th+3 -> zero (flat-slice slop only).
    Scratch cols: 0..wd-1 -> image cols, wd..wp_pad-1 -> zero.  The left pad of each
                  output row is provided by the zero tail of the previous row after the
                  buffer is flattened row-major (wrap-around).
    """
    if want_pre:
        o_pre_ref, o_post_ref, xbuf, sem = refs
    else:
        o_ref, xbuf, sem = refs

    i = pl.program_id(0)
    s = pl.program_id(1)
    ns = pl.num_programs(1)

    rows = th + 4
    cin = xbuf.shape[-1]
    cout = w_ref.shape[-1]
    m = th * wp_pad                       # flattened output positions per strip
    L = m + 2 * wp_pad                    # rows of the lane-concatenated operand

    # ---- zero the regions no DMA writes (all issued before any DMA starts) ----
    zrow = jnp.zeros((1, wp_pad, cin), xbuf.dtype)
    xbuf[:, wd:, :] = jnp.zeros((rows, wp_pad - wd, cin), xbuf.dtype)   # pad columns
    xbuf[0:1, :, :] = zrow                                              # wrap-pad row
    xbuf[rows - 1:rows, :, :] = zrow                                    # slop-only row

    @pl.when(s == 0)
    def _():                              # top image border -> zero top halo row
        xbuf[1:2, :, :] = zrow

    @pl.when(s == ns - 1)
    def _():                              # bottom image border -> zero bottom halo row
        xbuf[th + 2:th + 3, :, :] = zrow

    # ---- DMA the strip rows (+ halo rows) straight from the unpadded HBM image ----
    core = pltpu.make_async_copy(x_hbm.at[i, pl.ds(s * th, th)],
                                 xbuf.at[pl.ds(2, th), pl.ds(0, wd)], sem.at[0])
    core.start()

    @pl.when(s > 0)
    def _():
        cp = pltpu.make_async_copy(x_hbm.at[i, pl.ds(s * th - 1, 1)],
                                   xbuf.at[pl.ds(1, 1), pl.ds(0, wd)], sem.at[1])
        cp.start()
        cp.wait()

    @pl.when(s < ns - 1)
    def _():
        cp = pltpu.make_async_copy(x_hbm.at[i, pl.ds((s + 1) * th, 1)],
                                   xbuf.at[pl.ds(th + 2, 1), pl.ds(0, wd)], sem.at[2])
        cp.start()
        cp.wait()

    core.wait()

    # ---- compute: 3 matmuls with K = 3*Cin (dx folded into the lane axis) ----
    x = xbuf[...].reshape(rows * wp_pad, cin)
    xcat = jnp.concatenate(
        [x[wp_pad - 1:wp_pad - 1 + L],    # dx = 0 (left pad comes from the wrap zeros)
         x[wp_pad:wp_pad + L],            # dx = 1
         x[wp_pad + 1:wp_pad + 1 + L]],   # dx = 2
        axis=-1)                          # (L, 3*Cin)

    acc = jnp.zeros((m, cout), jnp.float32)
    for dy in range(3):                   # sublane-aligned (multiple-of-8) slices
        acc = acc + jnp.dot(xcat[dy * wp_pad:dy * wp_pad + m], w_ref[dy],
                            preferred_element_type=jnp.float32)

    y = acc + b_ref[...]
    y = y.reshape(th, wp_pad, cout)[:, :wd, :]     # drop pad columns in-kernel
    if want_pre:                                   # pre-ReLU collected + post-ReLU forwarded
        o_pre_ref[0] = y.astype(o_pre_ref.dtype)
        o_post_ref[0] = jnp.maximum(y, 0.0).astype(o_post_ref.dtype)
    else:
        if apply_relu:                             # fused ReLU epilogue
            y = jnp.maximum(y, 0.0)
        o_ref[0] = y.astype(o_ref.dtype)


def conv3x3_same(x, w_k, b, *, apply_relu, want_pre=False, max_rows=_MAX_STRIP_ROWS):
    """3x3 stride-1 'same' conv.  x: (N,H,W,Cin) bf16, w_k: (3,3*Cin,Cout) bf16,
    b: (1,Cout) f32.  Returns post-activation, or (pre, post) when want_pre."""
    n, h, wd, cin = x.shape
    cout = w_k.shape[-1]
    th = _largest_divisor(h, max_rows)
    ns = h // th
    wp_pad = _round_up(wd + 2, 8)         # sublane-aligned row pitch (>= 2 zero pad cols)

    kernel = functools.partial(_conv3x3_kernel, th=th, wd=wd, wp_pad=wp_pad,
                               apply_relu=apply_relu, want_pre=want_pre)
    out_sds = jax.ShapeDtypeStruct((n, h, wd, cout), jnp.bfloat16)
    out_spec = pl.BlockSpec((1, th, wd, cout), lambda i, s: (i, s, 0, 0))

    return pl.pallas_call(
        kernel,
        out_shape=(out_sds, out_sds) if want_pre else out_sds,
        grid=(n, ns),
        in_specs=[
            pl.BlockSpec(memory_space=pl.ANY),                       # activation in HBM
            pl.BlockSpec((3, 3 * cin, cout), lambda i, s: (0, 0, 0)),  # weights: fetched once
            pl.BlockSpec((1, cout), lambda i, s: (0, 0)),
        ],
        out_specs=(out_spec, out_spec) if want_pre else out_spec,
        scratch_shapes=[
            pltpu.VMEM((th + 4, wp_pad, cin), jnp.bfloat16),
            pltpu.SemaphoreType.DMA((3,)),
        ],
        compiler_params=pltpu.CompilerParams(
            dimension_semantics=("parallel", "parallel"),
            vmem_limit_bytes=_VMEM_LIMIT),
    )(x, w_k, b)


# ---------------------------------------------------------------------------
# First-layer (Cin=3) path: K=27 im2col + single matmul kernel
# ---------------------------------------------------------------------------

def _matmul_bias_kernel(x_ref, w_ref, b_ref, *out_refs, apply_relu, want_pre):
    y = jnp.dot(x_ref[0], w_ref[...], preferred_element_type=jnp.float32) + b_ref[...]
    if want_pre:
        o_pre_ref, o_post_ref = out_refs
        o_pre_ref[0] = y.astype(o_pre_ref.dtype)
        o_post_ref[0] = jnp.maximum(y, 0.0).astype(o_post_ref.dtype)
    else:
        o_ref, = out_refs
        if apply_relu:
            y = jnp.maximum(y, 0.0)
        o_ref[0] = y.astype(o_ref.dtype)


def conv3x3_small_cin(x, w_k, b, *, apply_relu, want_pre=False,
                      max_rows=_MAX_STRIP_ROWS):
    """Cin <= 8 path (only the first VGG conv): the 3-channel input is tiny, so a K=9*Cin
    im2col is built once in XLA and a single strip-tiled matmul runs on the MXU."""
    n, h, wd, cin = x.shape
    cout = w_k.shape[-1]
    w_flat = w_k.reshape(9 * cin, cout)

    th = _largest_divisor(h, max_rows)
    if (th * wd) % 8 != 0:                # keep the row-block sublane-divisible
        th = h
    ns = h // th
    tm = th * wd

    xp = jnp.pad(x, ((0, 0), (1, 1), (1, 1), (0, 0)))
    cols = jnp.concatenate(
        [xp[:, dy:dy + h, dx:dx + wd, :] for dy in range(3) for dx in range(3)],
        axis=-1).reshape(n, h * wd, 9 * cin)

    kernel = functools.partial(_matmul_bias_kernel, apply_relu=apply_relu,
                               want_pre=want_pre)
    out_sds = jax.ShapeDtypeStruct((n, h * wd, cout), jnp.bfloat16)
    out_spec = pl.BlockSpec((1, tm, cout), lambda i, s: (i, s, 0))
    res = pl.pallas_call(
        kernel,
        out_shape=(out_sds, out_sds) if want_pre else out_sds,
        grid=(n, ns),
        in_specs=[
            pl.BlockSpec((1, tm, 9 * cin), lambda i, s: (i, s, 0)),
            pl.BlockSpec((9 * cin, cout), lambda i, s: (0, 0)),
            pl.BlockSpec((1, cout), lambda i, s: (0, 0)),
        ],
        out_specs=(out_spec, out_spec) if want_pre else out_spec,
        compiler_params=pltpu.CompilerParams(
            dimension_semantics=("parallel", "parallel"),
            vmem_limit_bytes=_VMEM_LIMIT),
    )(cols, w_flat, b)
    if want_pre:
        return tuple(r.reshape(n, h, wd, cout) for r in res)
    return res.reshape(n, h, wd, cout)


# ---------------------------------------------------------------------------
# 2x2 max pool
# ---------------------------------------------------------------------------

def _maxpool_kernel(x_ref, o_ref):
    # x_ref: (1, PH, W//2, 2*C) -- even/odd columns folded onto the lane axis
    c = o_ref.shape[-1]
    x = x_ref[0]
    colmax = jnp.maximum(x[:, :, :c], x[:, :, c:])            # pool along W (lane slices)
    ph, wh = colmax.shape[0], colmax.shape[1]
    o_ref[0] = jnp.max(colmax.reshape(ph // 2, 2, wh, c), axis=1)   # pool along H


def maxpool2x2(x):
    """MaxPool2d(kernel=2, stride=2).  x: (N,H,W,C) with even H, W."""
    n, h, wd, c = x.shape
    assert h % 2 == 0 and wd % 2 == 0
    x2 = x.reshape(n, h, wd // 2, 2 * c)          # fold column parity onto lanes (free)
    ph = _largest_divisor(h, _MAX_STRIP_ROWS, multiple_of=2)
    return pl.pallas_call(
        _maxpool_kernel,
        out_shape=jax.ShapeDtypeStruct((n, h // 2, wd // 2, c), x.dtype),
        grid=(n, h // ph),
        in_specs=[pl.BlockSpec((1, ph, wd // 2, 2 * c), lambda i, s: (i, s, 0, 0))],
        out_specs=pl.BlockSpec((1, ph // 2, wd // 2, c), lambda i, s: (i, s, 0, 0)),
        compiler_params=pltpu.CompilerParams(
            dimension_semantics=("parallel", "parallel")),
    )(x2)


# ---------------------------------------------------------------------------
# VGG16 "features" (same layer sequence / indices as torchvision)
# ---------------------------------------------------------------------------

VGG16_CFG = [64, 64, "M", 128, 128, "M", 256, 256, 256, "M",
             512, 512, 512, "M", 512, 512, 512, "M"]


def build_vgg16_features(key):
    layers = []
    cin = 3
    for v in VGG16_CFG:
        if v == "M":
            layers.append(("pool", None))
        else:
            key, kw, kb = jax.random.split(key, 3)
            w = jax.random.normal(kw, (3, 3, cin, v), jnp.float32) * np.float32(
                np.sqrt(2.0 / (9 * cin)))
            b = 0.01 * jax.random.normal(kb, (v,), jnp.float32)
            w_k = w.reshape(3, 3 * cin, v).astype(jnp.bfloat16)   # per-dy, dx folded into K
            layers.append(("conv", (w_k, b.reshape(1, v).astype(jnp.float32))))
            layers.append(("relu", None))
            cin = v
    return layers


def _conv_layer(x, w_k, b, *, relu, want_pre):
    if x.shape[-1] <= 8:
        return conv3x3_small_cin(x, w_k, b, apply_relu=relu, want_pre=want_pre)
    return conv3x3_same(x, w_k, b, apply_relu=relu, want_pre=want_pre)


class NetVGGFeatures:
    """JAX/Pallas port of the PyTorch NetVGGFeatures module (frozen, eval-mode)."""

    def __init__(self, layer_ids, key):
        self.features = build_vgg16_features(key)
        self.layer_ids = list(layer_ids)

    def forward(self, x_nchw):
        last = self.layer_ids[-1]
        to_nchw = lambda t: jnp.transpose(t, (0, 3, 1, 2)).astype(jnp.float32)
        x = jnp.transpose(x_nchw, (0, 2, 3, 1)).astype(jnp.bfloat16)   # one entry transpose
        outputs = []
        i = 0
        while i <= last:
            kind, params = self.features[i]
            if kind == "conv":
                has_relu = (i + 1 <= last)        # in VGG a ReLU always follows a conv
                if has_relu:
                    if i in self.layer_ids:       # collect pre-ReLU, forward post-ReLU
                        pre, post = _conv_layer(x, *params, relu=True, want_pre=True)
                        outputs.append(to_nchw(pre))
                        x = post
                    else:
                        x = _conv_layer(x, *params, relu=True, want_pre=False)
                    if (i + 1) in self.layer_ids:
                        outputs.append(to_nchw(x))
                    i += 2                        # conv + fused ReLU
                else:                             # conv is the last requested layer
                    x = _conv_layer(x, *params, relu=False, want_pre=False)
                    if i in self.layer_ids:
                        outputs.append(to_nchw(x))
                    i += 1
            elif kind == "pool":
                x = maxpool2x2(x)
                if i in self.layer_ids:
                    outputs.append(to_nchw(x))
                i += 1
            else:                                 # bare ReLU: unreachable with this cfg
                x = jnp.maximum(x, 0)
                if i in self.layer_ids:
                    outputs.append(to_nchw(x))
                i += 1
        return outputs


# ---------------------------------------------------------------------------
# Demo / correctness checks
# ---------------------------------------------------------------------------

if __name__ == "__main__":
    key = jax.random.PRNGKey(0)
    x_key, w_key, t_key = jax.random.split(key, 3)

    # NCHW, 3 input channels (VGG requirement), small spatial size.
    x = jax.random.normal(x_key, (2, 3, 16, 16), dtype=jnp.float32)

    layer_ids = [2, 7, 12]                # conv outputs before their ReLUs (dlp2-style)
    net = NetVGGFeatures(layer_ids, key=w_key)
    outputs = [jax.block_until_ready(o) for o in net.forward(x)]

    expected_shapes = [(2, 64, 16, 16), (2, 128, 8, 8), (2, 256, 4, 4)]
    assert [tuple(o.shape) for o in outputs] == expected_shapes, \
        [tuple(o.shape) for o in outputs]
    assert all(bool(jnp.all(jnp.isfinite(o))) for o in outputs)

    # --- check 1: Cin=3 first-layer path vs XLA conv ---------------------------
    w0_k, b0 = net.features[0][1]
    x_nhwc = jnp.transpose(x, (0, 2, 3, 1)).astype(jnp.bfloat16)
    got0 = conv3x3_small_cin(x_nhwc, w0_k, b0, apply_relu=False).astype(jnp.float32)
    w0 = w0_k.astype(jnp.float32).reshape(3, 3, 3, 64)
    ref0 = lax.conv_general_dilated(
        x_nhwc.astype(jnp.float32), w0, (1, 1), "SAME",
        dimension_numbers=("NHWC", "HWIO", "NHWC")) + b0.reshape(1, 1, 1, 64)
    np.testing.assert_allclose(np.asarray(jax.block_until_ready(got0)),
                               np.asarray(ref0), atol=5e-2, rtol=5e-2)

    # --- check 2: general path, multi-strip halo DMA + dual (pre/post) output --
    k1, k2, k3 = jax.random.split(t_key, 3)
    cin, cout, ht, wt = 64, 128, 24, 16
    xt = jax.random.normal(k1, (1, ht, wt, cin), jnp.float32).astype(jnp.bfloat16)
    wt_f = (jax.random.normal(k2, (3, 3, cin, cout), jnp.float32)
            * np.float32(np.sqrt(2.0 / (9 * cin))))
    bt = 0.01 * jax.random.normal(k3, (1, cout), jnp.float32)
    wt_k = wt_f.reshape(3, 3 * cin, cout).astype(jnp.bfloat16)
    pre, post = conv3x3_same(xt, wt_k, bt, apply_relu=True, want_pre=True, max_rows=8)
    ref = lax.conv_general_dilated(
        xt.astype(jnp.float32), wt_k.astype(jnp.float32).reshape(3, 3, cin, cout),
        (1, 1), "SAME",
        dimension_numbers=("NHWC", "HWIO", "NHWC")) + bt.reshape(1, 1, 1, cout)
    pre = np.asarray(jax.block_until_ready(pre).astype(jnp.float32))
    post = np.asarray(jax.block_until_ready(post).astype(jnp.float32))
    np.testing.assert_allclose(pre, np.asarray(ref), atol=3e-2, rtol=3e-2)
    np.testing.assert_allclose(post, np.maximum(np.asarray(ref), 0.0),
                               atol=3e-2, rtol=3e-2)

    # --- check 3: 2x2 maxpool ---------------------------------------------------
    xm = jax.random.normal(k1, (2, 8, 8, 64), jnp.float32).astype(jnp.bfloat16)
    gotm = jax.block_until_ready(maxpool2x2(xm))
    refm = jnp.max(xm.reshape(2, 4, 2, 4, 2, 64), axis=(2, 4))
    np.testing.assert_array_equal(np.asarray(gotm), np.asarray(refm))

    print("KERNEL_OK")
</pallas_src>

<mosaic_0001>
module attributes {stable_mosaic.version = 11 : i64} {
  func.func @_matmul_bias_kernel(%arg0: i32, %arg1: i32, %arg2: memref<1x256x27xbf16, #tpu.memory_space<vmem>>, %arg3: memref<27x64xbf16, #tpu.memory_space<vmem>>, %arg4: memref<1x64xf32, #tpu.memory_space<vmem>>, %arg5: memref<1x256x64xbf16, #tpu.memory_space<vmem>>) attributes {dimension_semantics = [#tpu.dimension_semantics<parallel>, #tpu.dimension_semantics<parallel>], iteration_bounds = array<i64: 2, 1>, scalar_prefetch = 0 : i64, scratch_operands = 0 : i64, tpu.core_type = #tpu.core_type<tc>, window_params = [{transform_indices = @transform_0, window_bounds = array<i64: 1, 256, 27>}, {pipeline_mode = #tpu.pipeline_mode<synchronous>, transform_indices = @transform_1, window_bounds = array<i64: 27, 64>}, {pipeline_mode = #tpu.pipeline_mode<synchronous>, transform_indices = @transform_2, window_bounds = array<i64: 1, 64>}, {transform_indices = @transform_3, window_bounds = array<i64: 1, 256, 64>}]} {
    %c0 = arith.constant 0 : index
    %c0_0 = arith.constant 0 : index
    %c0_1 = arith.constant 0 : index
    %0 = vector.load %arg2[%c0, %c0_0, %c0_1] : memref<1x256x27xbf16, #tpu.memory_space<vmem>>, vector<1x256x27xbf16>
    %1 = vector.shape_cast %0 : vector<1x256x27xbf16> to vector<256x27xbf16>
    %c0_2 = arith.constant 0 : index
    %c0_3 = arith.constant 0 : index
    %2 = vector.load %arg3[%c0_2, %c0_3] : memref<27x64xbf16, #tpu.memory_space<vmem>>, vector<27x64xbf16>
    %cst = arith.constant dense<0.000000e+00> : vector<256x64xf32>
    %3 = tpu.matmul %1, %2, %cst {dimension_numbers = #tpu.dot_dimension_numbers<[1], [0], [0], [1], [0, 0, 1, 1], [], []>} : vector<256x27xbf16>, vector<27x64xbf16>, vector<256x64xf32> -> vector<256x64xf32>
    %c0_4 = arith.constant 0 : index
    %c0_5 = arith.constant 0 : index
    %4 = vector.load %arg4[%c0_4, %c0_5] : memref<1x64xf32, #tpu.memory_space<vmem>>, vector<1x64xf32>
    %5 = vector.broadcast %4 : vector<1x64xf32> to vector<256x64xf32>
    %6 = arith.addf %3, %5 : vector<256x64xf32>
    %cst_6 = arith.constant 0.000000e+00 : f32
    %7 = vector.broadcast %cst_6 : f32 to vector<256x64xf32>
    %8 = arith.maximumf %6, %7 : vector<256x64xf32>
    %9 = arith.truncf %8 : vector<256x64xf32> to vector<256x64xbf16>
    %c0_7 = arith.constant 0 : index
    %c0_8 = arith.constant 0 : index
    %c0_9 = arith.constant 0 : index
    %10 = vector.load %arg5[%c0_7, %c0_8, %c0_9] : memref<1x256x64xbf16, #tpu.memory_space<vmem>>, vector<1x256x64xbf16>
    %11 = vector.shape_cast %10 : vector<1x256x64xbf16> to vector<256x64xbf16>
    %12 = vector.shape_cast %9 : vector<256x64xbf16> to vector<1x256x64xbf16>
    tpu.vector_store %arg5[%c0_7, %c0_8, %c0_9], %12 {strides = array<i32>} : memref<1x256x64xbf16, #tpu.memory_space<vmem>>, vector<1x256x64xbf16>,
    return
  }
  func.func @transform_0(%arg0: i32, %arg1: i32) -> (i32, i32, i32) {
    %c0_i32 = arith.constant 0 : i32
    %c0_i32_0 = arith.constant 0 : i32
    return %arg0, %arg1, %c0_i32 : i32, i32, i32
  }
  func.func @transform_1(%arg0: i32, %arg1: i32) -> (i32, i32) {
    %c0_i32 = arith.constant 0 : i32
    %c0_i32_0 = arith.constant 0 : i32
    %c0_i32_1 = arith.constant 0 : i32
    return %c0_i32, %c0_i32_0 : i32, i32
  }
  func.func @transform_2(%arg0: i32, %arg1: i32) -> (i32, i32) {
    %c0_i32 = arith.constant 0 : i32
    %c0_i32_0 = arith.constant 0 : i32
    %c0_i32_1 = arith.constant 0 : i32
    return %c0_i32, %c0_i32_0 : i32, i32
  }
  func.func @transform_3(%arg0: i32, %arg1: i32) -> (i32, i32, i32) {
    %c0_i32 = arith.constant 0 : i32
    %c0_i32_0 = arith.constant 0 : i32
    return %arg0, %arg1, %c0_i32 : i32, i32, i32
  }
}

</mosaic_0001>

<bundles_post_ra>
// kernel: tpu_custom_call.1
= control target key start
LH: loop header
LB: loop body
LE: loop exit
PB: predicated region body
PF: predicated region fallthrough
CT: control target
= control target key end

     0   :  { %s1100_s12 = smov 0   ;;  %s1102_s13 = smov 0   ;;  %s1283_s0 = inlined_call_operand.vmem [shape: bf16[2,256,27], index: 0, kind: input, shape index: {}]   ;;  %s1284_s1 = inlined_call_operand.vmem [shape: bf16[27,64], index: 1, kind: input, shape index: {}]   ;;  %s1285_s2 = inlined_call_operand.vmem [shape: f32[1,64], index: 2, kind: input, shape index: {}]   ;;  %s1286_s3 = inlined_call_operand.vmem [shape: bf16[2,256,64], index: 3, kind: output, shape index: {}]  }
   0x1   :  { %s1104_s14 = smov 0  }
   0x2 LB: > { %s25_s15 = sadd.s32 1, %s1073_s13  ;;  %p846_p0 = scmp.ge.s32.totalorder %s1077_s14, 1  ;;  %s1077_s14 = sphi %s1104_s14, %s13_s14   ;;  %s1073_s13 = sphi %s1102_s13, %s1288_s13   ;;  %s1069_s12 = sphi %s1100_s12, %s1287_s12  }
   0x3   : > { %p27_p1 = scmp.ge.s32.totalorder %s25_s15, 2  ;;  %p158_p2 = scmp.lt.s32.totalorder %s1077_s14, 3 }
   0x5   : > { %s1290_s15 = smov (%p27_p1, %s25_s15), 0  ;;  %p159_p3 = pnand %p846_p0, %p158_p2 }
   0x6   : > { %v1037_v0 = vld [vmem:[%s1284_s1] sm:$0xff] (!%p159_p3)   ;;  %vm394_vm0 = vcmask (!%p159_p3), 1044480   ;;  %v1038_v1 = vld [vmem:[%s1284_s1 + $0x8] sm:$0x3f] (!%p159_p3)   ;;  %vm395_vm1 = vcmask (!%p159_p3), 1045504   ;;  %p191_p4 = scmp.lt.s32.totalorder (!%p159_p3), %s1069_s12, 1 }
   0x7   : > { %162 = sbr.rel (%p159_p3) target bundleno = 266 (0x10a), region = 32  ;;  %972 = vmatprep.subr.bf16.mxu0 (!%p159_p3), %v1037_v0  ;;  %1008 = vmatprep.subr.bf16.mxu1 (!%p159_p3), %v1037_v0  ;;  %v1079_v2 = vmov (!%p159_p3), 65535   ;;  %vm345_vm2 = vcmask (!%p159_p3), 220160   ;;  %v1169_v22 = vld [vmem:[%s1285_s2] ss:$0 sm:$0xff] (!%p159_p3)  ;;  %vm722_vm3 = vcmask (!%p159_p3), 519168  }
   0x8   : > { %973 = vmatpush3.bf16.msra.mxu0 (!%p159_p3), %v1037_v0  ;;  %1010 = vmatpush3.bf16.msra.mxu1 (!%p159_p3), %v1037_v0  ;;  %v396_v3 = vsel (!%p159_p3), %vm394_vm0, 4294967295, %v1079_v2 }
   0x9   : > { %v397_v4 = vsel (!%p159_p3), %vm395_vm1, %v396_v3, 0 }
   0xa   : > { %v399_v5 = vand.u32 (!%p159_p3), %v1038_v1, %v397_v4 }
   0xc   : > { %974 = vmatprep.subr.bf16.mxu0 (!%p159_p3), %v399_v5  ;;  %1009 = vmatprep.subr.bf16.mxu1 (!%p159_p3), %v399_v5 }
   0xd   : > { %975 = vmatpush3.bf16.msra.mxu0 (!%p159_p3), %v399_v5  ;;  %1011 = vmatpush3.bf16.msra.mxu1 (!%p159_p3), %v399_v5 }
   0xe   : > { %s1292_s12 = smov (!%p191_p4, %s1069_s12), 1 }
   0xf   : > { %s920_s20 = sshll.u32 %s1292_s12, 7 }
  0x10   : > { %s1132_s23 = scalar_lea.vmem %s1283_s0, %s920_s20  ;;  %s1181_s28 = scalar_lea.vmem %s1286_s3, %s920_s20 }
  0x11   : > { %v1039_v6 = vld [vmem:[%s1132_s23] sm:$0xff]   ;;  %v1041_v8 = vld [vmem:[%s1132_s23 + $0x8] sm:$0xff]   ;;  %v1043_v10 = vld [vmem:[%s1132_s23 + $0x10] sm:$0xff]  }
  0x12   : > { %v1040_v7 = vld [vmem:[%s1132_s23 + $0x40] sm:$0xff]   ;;  %976 = vmatprep.mubr.msk.bf16.mxu0 %vm345_vm2, %v1039_v6  ;;  %v1042_v9 = vld [vmem:[%s1132_s23 + $0x48] sm:$0xff]   ;;  %v1044_v11 = vld [vmem:[%s1132_s23 + $0x50] sm:$0xff]  }
  0x13   : > { %992 = vmatprep.mubr.msk.bf16.mxu1 %vm345_vm2, %v1040_v7  ;;  %977 = vmatmul.mubr.msk.bf16.vlgmr.msra.gmra.mrb[0].mxu0 %vm345_vm2, %v1041_v8  ;;  %v1045_v12 = vld [vmem:[%s1132_s23 + $0x18] sm:$0xff]   ;;  %v1047_v14 = vld [vmem:[%s1132_s23 + $0x20] sm:$0xff]   ;;  %v1049_v16 = vld [vmem:[%s1132_s23 + $0x28] sm:$0xff]  }
  0x14   : > { %993 = vmatmul.mubr.msk.bf16.vlgmr.msra.gmra.mrb[0].mxu1 %vm345_vm2, %v1042_v9  ;;  %980 = vmatprep.mubr.msk.bf16.mxu0 %vm345_vm2, %v1043_v10  ;;  %v1046_v13 = vld [vmem:[%s1132_s23 + $0x58] sm:$0xff]   ;;  %v1048_v15 = vld [vmem:[%s1132_s23 + $0x60] sm:$0xff]   ;;  %v1050_v17 = vld [vmem:[%s1132_s23 + $0x68] sm:$0xff]  }
  0x15   : > { %996 = vmatprep.mubr.msk.bf16.mxu1 %vm345_vm2, %v1044_v11  ;;  %v1051_v18 = vld [vmem:[%s1132_s23 + $0x30] sm:$0xff]   ;;  %v1053_v20 = vld [vmem:[%s1132_s23 + $0x38] sm:$0xff]  }
  0x16   : > { %v1052_v19 = vld [vmem:[%s1132_s23 + $0x70] sm:$0xff]   ;;  %v1054_v21 = vld [vmem:[%s1132_s23 + $0x78] sm:$0xff]  }
  0x1b   : > { %981 = vmatmul.mubr.msk.bf16.gmra.mrb[4].mxu0 %vm345_vm2, %v1045_v12 }
  0x1c   : > { %997 = vmatmul.mubr.msk.bf16.gmra.mrb[4].mxu1 %vm345_vm2, %v1046_v13  ;;  %984 = vmatprep.mubr.msk.bf16.mxu0 %vm345_vm2, %v1047_v14 }
  0x1d   : > { %1000 = vmatprep.mubr.msk.bf16.mxu1 %vm345_vm2, %v1048_v15 }
  0x23   : > { %985 = vmatmul.mubr.msk.bf16.gmra.mrb[8].mxu0 %vm345_vm2, %v1049_v16 }
  0x24   : > { %1001 = vmatmul.mubr.msk.bf16.gmra.mrb[8].mxu1 %vm345_vm2, %v1050_v17  ;;  %988 = vmatprep.mubr.msk.bf16.mxu0 %vm345_vm2, %v1051_v18 }
  0x25   : > { %1004 = vmatprep.mubr.msk.bf16.mxu1 %vm345_vm2, %v1052_v19 }
  0x2b   : > { %989 = vmatmul.mubr.msk.bf16.gmra.mrb[12].mxu0 %vm345_vm2, %v1053_v20 }
  0x2c   : > { %1005 = vmatmul.mubr.msk.bf16.gmra.mrb[12].mxu1 %vm345_vm2, %v1054_v21 }
  0xe6   : > { %v978_v23 = vpop.f32.mrb[0].mxu0 }
  0xe7   : > { %v444_v24 = vadd.f32 %v978_v23, %v1169_v22  ;;  %v994_v25 = vpop.f32.mrb[0].mxu1  ;;  %v435_v26 = vpop.f32.mrb[1].mxu0 }
  0xe8   : > { %v508_v27 = vadd.f32 %v994_v25, %v1169_v22  ;;  %v436_v28 = vadd.f32 %v1169_v22, %v435_v26  ;;  %v499_v29 = vpop.f32.mrb[1].mxu1  ;;  %v979_v30 = vpop.f32.mrb[2].mxu0 }
  0xe9   : > { %v564_v31 = vmax.f32 %v444_v24, 0.0  ;;  %v500_v32 = vadd.f32 %v1169_v22, %v499_v29  ;;  %v447_v33 = vadd.f32 %v979_v30, %v1169_v22  ;;  %v995_v34 = vpop.f32.mrb[2].mxu1  ;;  %v438_v35 = vpop.f32.mrb[3].mxu0 }
  0xea   : > { %v580_v36 = vmax.f32 %v508_v27, 0.0  ;;  %v562_v37 = vmax.f32 %v436_v28, 0.0  ;;  %v511_v38 = vadd.f32 %v995_v34, %v1169_v22  ;;  %v439_v39 = vadd.f32 %v1169_v22, %v438_v35  ;;  %v502_v40 = vpop.f32.mrb[3].mxu1 }
  0xeb   : > { %v924_v41 = vpack.c.bf16 %v564_v31, %v564_v31  ;;  %v578_v42 = vmax.f32 %v500_v32, 0.0  ;;  %v565_v43 = vmax.f32 %v447_v33, 0.0  ;;  %v503_v44 = vadd.f32 %v1169_v22, %v502_v40 }
  0xec   : > { %v940_v45 = vpack.c.bf16 %v580_v36, %v580_v36  ;;  %v922_v46 = vpack.c.bf16 %v562_v37, %v562_v37  ;;  %v581_v47 = vmax.f32 %v511_v38, 0.0  ;;  %v563_v48 = vmax.f32 %v439_v39, 0.0 }
  0xed   : > { %725 = vst.msk [vmem:[%s1181_s28 + $0x8] sm:$0xf] %vm722_vm3, %v924_v41  ;;  %v938_v49 = vpack.c.bf16 %v578_v42, %v578_v42  ;;  %v925_v50 = vpack.c.bf16 %v565_v43, %v565_v43  ;;  %v579_v51 = vmax.f32 %v503_v44, 0.0 }
  0xee   : > { %741 = vst.msk [vmem:[%s1181_s28 + $0x48] sm:$0xf] %vm722_vm3, %v940_v45  ;;  %723 = vst.msk [vmem:[%s1181_s28] sm:$0xf] %vm722_vm3, %v922_v46  ;;  %v941_v52 = vpack.c.bf16 %v581_v47, %v581_v47  ;;  %v923_v53 = vpack.c.bf16 %v563_v48, %v563_v48  ;;  %v982_v54 = vpop.f32.mrb[4].mxu0 }
  0xef   : > { %739 = vst.msk [vmem:[%s1181_s28 + $0x40] sm:$0xf] %vm722_vm3, %v938_v49  ;;  %726 = vst.msk [vmem:[%s1181_s28 + $0xc] sm:$0xf] %vm722_vm3, %v925_v50  ;;  %v939_v55 = vpack.c.bf16 %v579_v51, %v579_v51  ;;  %v460_v56 = vadd.f32 %v982_v54, %v1169_v22  ;;  %v998_v57 = vpop.f32.mrb[4].mxu1  ;;  %v451_v58 = vpop.f32.mrb[5].mxu0 }
  0xf0   : > { %742 = vst.msk [vmem:[%s1181_s28 + $0x4c] sm:$0xf] %vm722_vm3, %v941_v52  ;;  %724 = vst.msk [vmem:[%s1181_s28 + $0x4] sm:$0xf] %vm722_vm3, %v923_v53  ;;  %v524_v59 = vadd.f32 %v998_v57, %v1169_v22  ;;  %v452_v60 = vadd.f32 %v1169_v22, %v451_v58  ;;  %v515_v61 = vpop.f32.mrb[5].mxu1  ;;  %v983_v62 = vpop.f32.mrb[6].mxu0 }
  0xf1   : > { %740 = vst.msk [vmem:[%s1181_s28 + $0x44] sm:$0xf] %vm722_vm3, %v939_v55  ;;  %v568_v63 = vmax.f32 %v460_v56, 0.0  ;;  %v516_v0 = vadd.f32 %v1169_v22, %v515_v61  ;;  %v463_v1 = vadd.f32 %v983_v62, %v1169_v22  ;;  %v999_v2 = vpop.f32.mrb[6].mxu1  ;;  %v454_v3 = vpop.f32.mrb[7].mxu0 }
  0xf2   : > { %v584_v4 = vmax.f32 %v524_v59, 0.0  ;;  %v566_v5 = vmax.f32 %v452_v60, 0.0  ;;  %v527_v6 = vadd.f32 %v999_v2, %v1169_v22  ;;  %v455_v7 = vadd.f32 %v1169_v22, %v454_v3  ;;  %v518_v8 = vpop.f32.mrb[7].mxu1 }
  0xf3   : > { %v928_v9 = vpack.c.bf16 %v568_v63, %v568_v63  ;;  %v582_v10 = vmax.f32 %v516_v0, 0.0  ;;  %v569_v11 = vmax.f32 %v463_v1, 0.0  ;;  %v519_v12 = vadd.f32 %v1169_v22, %v518_v8 }
  0xf4   : > { %v944_v13 = vpack.c.bf16 %v584_v4, %v584_v4  ;;  %v926_v14 = vpack.c.bf16 %v566_v5, %v566_v5  ;;  %v585_v15 = vmax.f32 %v527_v6, 0.0  ;;  %v567_v16 = vmax.f32 %v455_v7, 0.0 }
  0xf5   : > { %729 = vst.msk [vmem:[%s1181_s28 + $0x18] sm:$0xf] %vm722_vm3, %v928_v9  ;;  %v942_v17 = vpack.c.bf16 %v582_v10, %v582_v10  ;;  %v929_v18 = vpack.c.bf16 %v569_v11, %v569_v11  ;;  %v583_v19 = vmax.f32 %v519_v12, 0.0 }
  0xf6   : > { %745 = vst.msk [vmem:[%s1181_s28 + $0x58] sm:$0xf] %vm722_vm3, %v944_v13  ;;  %727 = vst.msk [vmem:[%s1181_s28 + $0x10] sm:$0xf] %vm722_vm3, %v926_v14  ;;  %v945_v20 = vpack.c.bf16 %v585_v15, %v585_v15  ;;  %v927_v21 = vpack.c.bf16 %v567_v16, %v567_v16  ;;  %v986_v23 = vpop.f32.mrb[8].mxu0 }
  0xf7   : > { %743 = vst.msk [vmem:[%s1181_s28 + $0x50] sm:$0xf] %vm722_vm3, %v942_v17  ;;  %730 = vst.msk [vmem:[%s1181_s28 + $0x1c] sm:$0xf] %vm722_vm3, %v929_v18  ;;  %v943_v24 = vpack.c.bf16 %v583_v19, %v583_v19  ;;  %v476_v25 = vadd.f32 %v986_v23, %v1169_v22  ;;  %v1002_v26 = vpop.f32.mrb[8].mxu1  ;;  %v467_v27 = vpop.f32.mrb[9].mxu0 }
  0xf8   : > { %746 = vst.msk [vmem:[%s1181_s28 + $0x5c] sm:$0xf] %vm722_vm3, %v945_v20  ;;  %728 = vst.msk [vmem:[%s1181_s28 + $0x14] sm:$0xf] %vm722_vm3, %v927_v21  ;;  %v540_v28 = vadd.f32 %v1002_v26, %v1169_v22  ;;  %v468_v29 = vadd.f32 %v1169_v22, %v467_v27  ;;  %v531_v30 = vpop.f32.mrb[9].mxu1  ;;  %v987_v31 = vpop.f32.mrb[10].mxu0 }
  0xf9   : > { %744 = vst.msk [vmem:[%s1181_s28 + $0x54] sm:$0xf] %vm722_vm3, %v943_v24  ;;  %v572_v32 = vmax.f32 %v476_v25, 0.0  ;;  %v532_v33 = vadd.f32 %v1169_v22, %v531_v30  ;;  %v479_v34 = vadd.f32 %v987_v31, %v1169_v22  ;;  %v1003_v35 = vpop.f32.mrb[10].mxu1  ;;  %v470_v36 = vpop.f32.mrb[11].mxu0 }
  0xfa   : > { %v588_v37 = vmax.f32 %v540_v28, 0.0  ;;  %v570_v38 = vmax.f32 %v468_v29, 0.0  ;;  %v543_v39 = vadd.f32 %v1003_v35, %v1169_v22  ;;  %v471_v40 = vadd.f32 %v1169_v22, %v470_v36  ;;  %v534_v41 = vpop.f32.mrb[11].mxu1 }
  0xfb   : > { %v932_v42 = vpack.c.bf16 %v572_v32, %v572_v32  ;;  %v586_v43 = vmax.f32 %v532_v33, 0.0  ;;  %v573_v44 = vmax.f32 %v479_v34, 0.0  ;;  %v535_v45 = vadd.f32 %v1169_v22, %v534_v41 }
  0xfc   : > { %v948_v46 = vpack.c.bf16 %v588_v37, %v588_v37  ;;  %v930_v47 = vpack.c.bf16 %v570_v38, %v570_v38  ;;  %v589_v48 = vmax.f32 %v543_v39, 0.0  ;;  %v571_v49 = vmax.f32 %v471_v40, 0.0 }
  0xfd   : > { %733 = vst.msk [vmem:[%s1181_s28 + $0x28] sm:$0xf] %vm722_vm3, %v932_v42  ;;  %v946_v50 = vpack.c.bf16 %v586_v43, %v586_v43  ;;  %v933_v51 = vpack.c.bf16 %v573_v44, %v573_v44  ;;  %v587_v52 = vmax.f32 %v535_v45, 0.0 }
  0xfe   : > { %749 = vst.msk [vmem:[%s1181_s28 + $0x68] sm:$0xf] %vm722_vm3, %v948_v46  ;;  %731 = vst.msk [vmem:[%s1181_s28 + $0x20] sm:$0xf] %vm722_vm3, %v930_v47  ;;  %v949_v53 = vpack.c.bf16 %v589_v48, %v589_v48  ;;  %v931_v54 = vpack.c.bf16 %v571_v49, %v571_v49  ;;  %v990_v55 = vpop.f32.mrb[12].mxu0 }
  0xff   : > { %747 = vst.msk [vmem:[%s1181_s28 + $0x60] sm:$0xf] %vm722_vm3, %v946_v50  ;;  %734 = vst.msk [vmem:[%s1181_s28 + $0x2c] sm:$0xf] %vm722_vm3, %v933_v51  ;;  %v947_v56 = vpack.c.bf16 %v587_v52, %v587_v52  ;;  %v492_v57 = vadd.f32 %v990_v55, %v1169_v22  ;;  %v1006_v58 = vpop.f32.mrb[12].mxu1  ;;  %v483_v59 = vpop.f32.mrb[13].mxu0 }
 0x100   : > { %750 = vst.msk [vmem:[%s1181_s28 + $0x6c] sm:$0xf] %vm722_vm3, %v949_v53  ;;  %732 = vst.msk [vmem:[%s1181_s28 + $0x24] sm:$0xf] %vm722_vm3, %v931_v54  ;;  %v556_v60 = vadd.f32 %v1006_v58, %v1169_v22  ;;  %v484_v61 = vadd.f32 %v1169_v22, %v483_v59  ;;  %v547_v62 = vpop.f32.mrb[13].mxu1  ;;  %v991_v63 = vpop.f32.mrb[14].mxu0 }
 0x101   : > { %748 = vst.msk [vmem:[%s1181_s28 + $0x64] sm:$0xf] %vm722_vm3, %v947_v56  ;;  %v576_v0 = vmax.f32 %v492_v57, 0.0  ;;  %v548_v1 = vadd.f32 %v1169_v22, %v547_v62  ;;  %v495_v2 = vadd.f32 %v991_v63, %v1169_v22  ;;  %v1007_v3 = vpop.f32.mrb[14].mxu1  ;;  %v486_v4 = vpop.f32.mrb[15].mxu0 }
 0x102   : > { %v592_v5 = vmax.f32 %v556_v60, 0.0  ;;  %v574_v6 = vmax.f32 %v484_v61, 0.0  ;;  %v559_v7 = vadd.f32 %v1007_v3, %v1169_v22  ;;  %v487_v8 = vadd.f32 %v1169_v22, %v486_v4  ;;  %v550_v9 = vpop.f32.mrb[15].mxu1 }
 0x103   : > { %v936_v10 = vpack.c.bf16 %v576_v0, %v576_v0  ;;  %v590_v11 = vmax.f32 %v548_v1, 0.0  ;;  %v577_v12 = vmax.f32 %v495_v2, 0.0  ;;  %v551_v13 = vadd.f32 %v1169_v22, %v550_v9 }
 0x104   : > { %v952_v14 = vpack.c.bf16 %v592_v5, %v592_v5  ;;  %v934_v15 = vpack.c.bf16 %v574_v6, %v574_v6  ;;  %v593_v16 = vmax.f32 %v559_v7, 0.0  ;;  %v575_v17 = vmax.f32 %v487_v8, 0.0 }
 0x105   : > { %737 = vst.msk [vmem:[%s1181_s28 + $0x38] sm:$0xf] %vm722_vm3, %v936_v10  ;;  %v950_v18 = vpack.c.bf16 %v590_v11, %v590_v11  ;;  %v937_v19 = vpack.c.bf16 %v577_v12, %v577_v12  ;;  %v591_v20 = vmax.f32 %v551_v13, 0.0 }
 0x106   : > { %753 = vst.msk [vmem:[%s1181_s28 + $0x78] sm:$0xf] %vm722_vm3, %v952_v14  ;;  %735 = vst.msk [vmem:[%s1181_s28 + $0x30] sm:$0xf] %vm722_vm3, %v934_v15  ;;  %v953_v21 = vpack.c.bf16 %v593_v16, %v593_v16  ;;  %v935_v23 = vpack.c.bf16 %v575_v17, %v575_v17 }
 0x107   : > { %751 = vst.msk [vmem:[%s1181_s28 + $0x70] sm:$0xf] %vm722_vm3, %v950_v18  ;;  %738 = vst.msk [vmem:[%s1181_s28 + $0x3c] sm:$0xf] %vm722_vm3, %v937_v19  ;;  %v951_v22 = vpack.c.bf16 %v591_v20, %v591_v20 }
 0x108   : > { %754 = vst.msk [vmem:[%s1181_s28 + $0x7c] sm:$0xf] %vm722_vm3, %v953_v21  ;;  %736 = vst.msk [vmem:[%s1181_s28 + $0x34] sm:$0xf] %vm722_vm3, %v935_v23 }
 0x109   : > { %752 = vst.msk [vmem:[%s1181_s28 + $0x74] sm:$0xf] %vm722_vm3, %v951_v22 }
 0x10a PF: > { %s13_s14 = sadd.s32 1, %s1077_s14   ;;  %s1287_s12 = smov %s1073_s13 }
 0x10b   : > { %p10_p5 = scmp.ge.s32.totalorder %s13_s14, 4   ;;  %s1288_s13 = smov %s1290_s15 }
 0x10d   :  { %12 = sbr.rel (!%p10_p5) target bundleno = 2 (0x2), region = 62 }

</bundles_post_ra>
